<compile_context>
chip_gen: v7x
topology: tpu7x:2x2x1
jax: 0.10.0
libtpu: 0.0.40
codegen_flags: <defaults>
</compile_context>

<pallas_src>
import functools

import jax
import jax.numpy as jnp
from jax.experimental import pallas as pl
from jax.experimental.pallas import tpu as pltpu


def _cyclic_shift_kernel(x_ref, o_ref, *, shift_rows, shift_lanes):
    # x_ref / o_ref: (BT, H, W*C) — BT images, channels folded into the lanes.
    x = x_ref[...]

    # W-roll: with C folded into the lane axis, rolling W by dw is a lane
    # rotation by dw*C: out[..., k] = x[..., (k - dw*C) mod (W*C)]  (same
    # convention as jnp.roll / torch.roll).  Lowers to an XLU lane rotate.
    if shift_lanes:
        x = pltpu.roll(x, shift=shift_lanes, axis=2)

    # H-roll: sublane rotation, out[:, i, :] = x[:, (i - dh) mod H, :].
    if shift_rows:
        x = pltpu.roll(x, shift=shift_rows, axis=1)

    # Single full-tile, lane-dense, unmasked store.
    o_ref[...] = x


def cyclic_shift(x, displacement, *, small_bytes_fallback=0):
    """out[b, i, j, c] = x[b, (i - d) % H, (j - d) % W, c]  (torch.roll on dims (1, 2))."""
    B, H, W, C = x.shape
    itemsize = x.dtype.itemsize
    total_bytes = B * H * W * C * itemsize

    shift_rows = displacement % H           # wrapped, non-negative row shift
    shift_lanes = (displacement % W) * C    # W-roll on the folded W*C lane axis

    if shift_rows == 0 and shift_lanes == 0:
        return x                            # no-op roll

    # Optional fast path: for tiny inputs XLA's fused roll is already at the
    # roofline and custom-call + pipeline overhead would dominate.
    if small_bytes_fallback and total_bytes < small_bytes_fallback:
        return jnp.roll(x, shift=(displacement, displacement), axis=(1, 2))

    lane_width = W * C
    per_image_bytes = H * lane_width * itemsize
    sublane_multiple = 8 * max(1, 4 // itemsize)   # 8 f32 / 16 bf16 / 32 int8 rows

    # Structural guards: keep every store lane-dense, keep the sublane roll on
    # a dtype-packed row tile, and keep one image's slab small enough that the
    # double-buffered pipeline fits v7x's 64 MiB/TC VMEM.
    if (lane_width % 128 != 0
            or H % sublane_multiple != 0
            or per_image_bytes > (6 << 20)):
        # TODO(synk): pad C to a 128-multiple lane width and add an H-tiled
        # variant (row-tile dividing shift_rows via the index_map, or a
        # pre/post-wrap grid split) instead of falling back to XLA's roll.
        return jnp.roll(x, shift=(displacement, displacement), axis=(1, 2))

    x2 = x.reshape(B, H, lane_width)        # free: row-major contiguous fold

    # How many images per grid step:
    #   * target ~2 MiB blocks so per-step overhead is amortized (85%+ of HBM BW),
    #   * keep >=8 grid steps when B allows (>=4 per v7x TensorCore),
    #   * pick an exact divisor of B so there are no padded boundary blocks.
    target_block_bytes = 2 << 20
    bt_cap = min(B,
                 max(1, target_block_bytes // per_image_bytes),
                 max(1, B // 8))
    bt = 1
    for d in range(bt_cap, 0, -1):
        if B % d == 0:
            bt = d
            break

    block_bytes = bt * per_image_bytes
    # 2 x (in block + out block) for double-buffering, plus headroom for
    # Mosaic's internal roll / relayout scratch.
    vmem_limit = 4 * block_bytes + (4 << 20)

    kernel = functools.partial(
        _cyclic_shift_kernel, shift_rows=shift_rows, shift_lanes=shift_lanes
    )

    out2 = pl.pallas_call(
        kernel,
        out_shape=jax.ShapeDtypeStruct((B, H, lane_width), x.dtype),
        grid_spec=pltpu.PrefetchScalarGridSpec(
            num_scalar_prefetch=0,
            grid=(B // bt,),
            in_specs=[pl.BlockSpec((bt, H, lane_width), lambda b: (b, 0, 0))],
            out_specs=pl.BlockSpec((bt, H, lane_width), lambda b: (b, 0, 0)),
        ),
        compiler_params=pltpu.CompilerParams(
            dimension_semantics=("parallel",),
            vmem_limit_bytes=vmem_limit,
        ),
        cost_estimate=pl.CostEstimate(
            flops=0, transcendentals=0, bytes_accessed=2 * total_bytes
        ),
    )(x2)

    return out2.reshape(B, H, W, C)


if __name__ == "__main__":
    key = jax.random.PRNGKey(0)
    B, H, W, C = 2, 16, 16, 32       # [batch, height, width, channels]
    x = jax.random.normal(key, (B, H, W, C), dtype=jnp.float32)

    ok = True
    for d in (-2, 3):                # Swin-style negative shift and a positive one
        out = cyclic_shift(x, d)
        jax.block_until_ready(out)
        ref = jnp.roll(x, shift=(d, d), axis=(1, 2))   # == torch.roll(x, (d, d), dims=(1, 2))
        ok = ok and bool(jnp.array_equal(out, ref))
    assert ok, "mismatch vs jnp.roll reference"

    print("KERNEL_OK")
</pallas_src>

<mosaic_0001>
module attributes {stable_mosaic.version = 11 : i64} {
  func.func @_cyclic_shift_kernel(%arg0: i32, %arg1: memref<1x16x512xf32, #tpu.memory_space<vmem>>, %arg2: memref<1x16x512xf32, #tpu.memory_space<vmem>>) attributes {dimension_semantics = [#tpu.dimension_semantics<parallel>], iteration_bounds = array<i64: 2>, scalar_prefetch = 0 : i64, scratch_operands = 0 : i64, tpu.core_type = #tpu.core_type<tc>, window_params = [{transform_indices = @transform_0, window_bounds = array<i64: 1, 16, 512>}, {transform_indices = @transform_1, window_bounds = array<i64: 1, 16, 512>}]} {
    %c0 = arith.constant 0 : index
    %c0_0 = arith.constant 0 : index
    %c0_1 = arith.constant 0 : index
    %0 = vector.load %arg1[%c0, %c0_0, %c0_1] : memref<1x16x512xf32, #tpu.memory_space<vmem>>, vector<1x16x512xf32>
    %c448_i32 = arith.constant 448 : i32
    %1 = tpu.dynamic_rotate %0 by %c448_i32 dim 2 : vector<1x16x512xf32>, i32 -> vector<1x16x512xf32>
    %c14_i32 = arith.constant 14 : i32
    %2 = tpu.dynamic_rotate %1 by %c14_i32 dim 1 : vector<1x16x512xf32>, i32 -> vector<1x16x512xf32>
    %c0_2 = arith.constant 0 : index
    %c0_3 = arith.constant 0 : index
    %c0_4 = arith.constant 0 : index
    %3 = vector.load %arg2[%c0_2, %c0_3, %c0_4] : memref<1x16x512xf32, #tpu.memory_space<vmem>>, vector<1x16x512xf32>
    tpu.vector_store %arg2[%c0_2, %c0_3, %c0_4], %2 {strides = array<i32>} : memref<1x16x512xf32, #tpu.memory_space<vmem>>, vector<1x16x512xf32>,
    return
  }
  func.func @transform_0(%arg0: i32) -> (i32, i32, i32) {
    %c0_i32 = arith.constant 0 : i32
    %c0_i32_0 = arith.constant 0 : i32
    %c0_i32_1 = arith.constant 0 : i32
    return %arg0, %c0_i32, %c0_i32_0 : i32, i32, i32
  }
  func.func @transform_1(%arg0: i32) -> (i32, i32, i32) {
    %c0_i32 = arith.constant 0 : i32
    %c0_i32_0 = arith.constant 0 : i32
    %c0_i32_1 = arith.constant 0 : i32
    return %arg0, %c0_i32, %c0_i32_0 : i32, i32, i32
  }
}

</mosaic_0001>

<bundles_post_ra>
// kernel: tpu_custom_call.1
= control target key start
LH: loop header
LB: loop body
LE: loop exit
PB: predicated region body
PF: predicated region fallthrough
CT: control target
= control target key end

     0   :  { %6 = vsyncpa [#allocation3], 0  ;;  %s659_s0 = inlined_call_operand.hbm [shape: f32[2,16,512], index: 0, kind: input, shape index: {}]   ;;  %s660_s1 = inlined_call_operand.hbm [shape: f32[2,16,512], index: 1, kind: output, shape index: {}]  }
   0x1   :  { %8 = vsyncpa [#allocation3 + $0x1], 0 }
   0x2   :  { %9 = vsyncpa [#allocation4], 0 }
   0x3   :  { %11 = vsyncpa [#allocation4 + $0x1], 0  ;;  %s466_s6 = smov 0   ;;  %s468_s7 = smov 0  }
   0x4   :  { %s470_s8 = smov 0   ;;  %s472_s9 = smov 0  }
   0x5 LB: > { %s487_s10 = sadd.s32 4294967295, %s447_s9   ;;  %s284_s11 = sadd.s32 4294967294, %s447_s9   ;;  %s447_s9 = sphi %s472_s9, %s673_s9   ;;  %s443_s8 = sphi %s470_s8, %s672_s8   ;;  %s439_s7 = sphi %s468_s7, %s671_s7   ;;  %s435_s6 = sphi %s466_s6, %s670_s6  }
   0x6   : > { %s491_s12 = sadd.s32 1, %s447_s9   ;;  %s24_s13 = sadd.s32 1, %s443_s8 }
   0x7   : > { %s21_s14 = ssub.s32 %s447_s9, %s491_s12  ;;  %p31_p0 = scmp.ne.s32.totalorder %s443_s8, %s439_s7 }
   0x8   : > { %p22_p1 = scmp.eq.s32.totalorder %s21_s14, 0  ;;  %p32_p2 = scmp.eq.s32.totalorder %s447_s9, 0 }
   0x9   : > { %p37_p3 = scmp.ne.s32.totalorder %s439_s7, %s435_s6  ;;  %p38_p4 = scmp.eq.s32.totalorder %s487_s10, 0 }
   0xa   : > { %s503_s15 = scalar_select %p22_p1, %s443_s8, %s24_s13  }
   0xb   : > { %p505_p5 = por %p32_p2, %p31_p0  ;;  %p509_p6 = por %p38_p4, %p37_p3 }
   0xc   : > { %p61_p7 = scmp.eq.s32.totalorder %s487_s10, 1  ;;  %p67_p8 = scmp.eq.s32.totalorder %s284_s11, 1 }
   0xd   : > { %p312_p10 = scmp.lt.s32.totalorder %s447_s9, 2  ;;  %s87_s20 = sand.u32 1, %s443_s8  }
   0xe   : > { %p516_p11 = por %p61_p7, %p31_p0  ;;  %p520_p12 = por %p67_p8, %p37_p3 }
   0xf   : > { %s298_s21 = sshll.u32 %s447_s9, 10  ;;  %s287_s22 = sshll.u32 %s87_s20, 6 }
  0x10   : > { %s664_s18 = scalar_select %p516_p11, 1, 0 }
  0x11   : > { %s665_s19 = scalar_select %p520_p12, 1, 0 }
  0x12   : > { %s529_s25 = scalar_lea.hbm %s659_s0, %s298_s21  ;;  %s91_s26 = scalar_lea.vmem [#allocation2], %s287_s22 }
  0x13   : > { %s98_s27 = sshll.u32 %s91_s26, 4  ;;  %p533_p13 = pnand %p312_p10, %p505_p5  ;;  %s537_s27 = int_to_ptr.vmem [resolvable:$true] %s98_s27 }
  0x14   : > { %s539_s29 = scalar_lea.sflag [#allocation3], %s87_s20  ;;  %s351_s30 = scalar_lea.hbm %s529_s25, 1024 }
  0x15   : > { %p352_p0 = scmp.ne.s32.totalorder %s529_s25, %s351_s30  ;;  %p353_p1 = pneg %p533_p13 }
  0x16   : > { %s356_s4 = scalar_lea.hbm %s659_s0, 2048  ;;  %p357_p4 = scmp.lt.u32.totalorder %s529_s25, %s659_s0 }
  0x17   : > { %p354_p2 = pnand %p353_p1, %p352_p0  ;;  %p358_p5 = scmp.lt.u32.totalorder %s356_s4, %s351_s30 }
  0x18   : > { %p360_p8 = scmp.lt.u32.totalorder %s351_s30, %s529_s25 }
  0x19   : > { %p355_p3 = pneg %p354_p2  ;;  %p359_p7 = por %p358_p5, %p357_p4 }
  0x1b   : > { %p361_p10 = por %p360_p8, %p359_p7 }
  0x1d   : > { %p362_p9 = pnand %p361_p10, %p355_p3 }
  0x1f   : > { %365 = shalt.err (!%p362_p9)
}
  0x20   : > { %s366_s13 = scalar_lea.vmem %s537_s27, 1024  ;;  %s449_s14 = smov [#allocation2]  }
  0x21   : > { %p367_p0 = scmp.ne.s32.totalorder %s537_s27, %s366_s13  ;;  %s371_s16 = sshll.u32 %s449_s14, 4  ;;  %s372_s16 = int_to_ptr.vmem [resolvable:$false] %s371_s16 }
  0x22   : > { %s373_s20 = scalar_lea.vmem %s372_s16, 2048  ;;  %p374_p11 = scmp.lt.s32.totalorder %s537_s27, %s372_s16 }
  0x23   : > { %p369_p2 = pnand %p367_p0, %p353_p1  ;;  %p375_p4 = scmp.lt.s32.totalorder %s373_s20, %s366_s13 }
  0x25   : > { %p370_p12 = pneg %p369_p2  ;;  %p376_p5 = por %p375_p4, %p374_p11 }
  0x27   : > { %p377_p7 = pnand %p376_p5, %p370_p12 }
  0x29   : > { %380 = shalt.err (!%p377_p7)
}
  0x2a   : > { %s450_s21 = smov 512   ;;  %s451_s22 = smov 32  }
  0x2b   : > { %307 = dma.hbm_to_vmem [thread:$0]  (!%p533_p13), %s529_s25, 1024, %s537_s27, %s539_s29, %s450_s21, %s450_s21, %s451_s22  }
  0x2c   : > { %p290_p9 = scmp.ge.s32.totalorder %s447_s9, 1  ;;  %p106_p1 = scmp.lt.s32.totalorder %s447_s9, 3 }
  0x2e   : > { %p107_p3 = pnand %p290_p9, %p106_p1 }
  0x2f   : > { %s570_s23 = sand.u32 (!%p107_p3), 1, %s439_s7  }
  0x30   : > { %110 = sbr.rel (%p107_p3) target bundleno = 204 (0xcc), region = 24  ;;  %s291_s24 = sshll.u32 (!%p107_p3), %s570_s23, 6 }
  0x31   : > { %s113_s26 = scalar_lea.sflag (!%p107_p3), [#allocation3], %s570_s23  ;;  %s116_s30 = scalar_lea.vmem (!%p107_p3), [#allocation2], %s291_s24 }
  0x37   : > { %426 = dma.done.wait (%p509_p6), %s113_s26, 1024  }
  0x38   : > { %428 = vsyncadd (%p509_p6), %s113_s26, 4294966272  ;;  %v136_v0 = vld [vmem:[%s116_s30 + $0x8] sm:$0xff]  ;;  %v135_v1 = vld [vmem:[%s116_s30] sm:$0xff]  ;;  %s452_s25 = smov 64   ;;  %v159_v8 = vlaneseq  ;;  %s586_s17 = scalar_lea.vmem [#allocation5], %s291_s24 }
  0x39   : > { %147 = vrot.lane.b32.xlu1 %v136_v0, %s452_s25  ;;  %143 = vrot.lane.b32.xlu0 %v135_v1, %s452_s25  ;;  %v140_v2 = vld [vmem:[%s116_s30 + $0x28] sm:$0xff]  ;;  %v139_v3 = vld [vmem:[%s116_s30 + $0x20] sm:$0xff]  ;;  %s299_s27 = sshll.u32 %s487_s10, 10  ;;  %s211_s28 = sshll.u32 %s586_s17, 4  ;;  %s607_s28 = int_to_ptr.vmem [resolvable:$true] %s211_s28 }
  0x3a   : > { %v141_v4 = vld [vmem:[%s116_s30 + $0x30] sm:$0xff]  ;;  %v142_v6 = vld [vmem:[%s116_s30 + $0x38] sm:$0xff]  ;;  %v160_v9 = vand.u32 127, %v159_v8  ;;  %v179_v12 = vshrl.u32 %v159_v8, 7  ;;  %s605_s2 = scalar_lea.hbm %s660_s1, %s299_s27  ;;  %s198_s3 = scalar_lea.sflag [#allocation4], %s570_s23 }
  0x3b   : > { %v137_v5 = vld [vmem:[%s116_s30 + $0x10] sm:$0xff]  ;;  %v138_v7 = vld [vmem:[%s116_s30 + $0x18] sm:$0xff]  ;;  %s381_s4 = scalar_lea.vmem %s607_s28, 1024  ;;  %p667_p11 = scmp.ne.s32.totalorder %s664_s18, 0 }
  0x3c   : > { %vm161_vm0 = vcmp.lt.s32.totalorder %v160_v9, 64  ;;  %vm180_vm1 = vcmp.lt.s32.totalorder %v179_v12, 6  ;;  %p382_p6 = scmp.ne.s32.totalorder %s607_s28, %s381_s4  ;;  %s453_s5 = smov [#allocation5]  }
  0x3d   : > { %149 = vrot.lane.b32.xlu1 %v140_v2, %s452_s25  ;;  %145 = vrot.lane.b32.xlu0 %v139_v3, %s452_s25  ;;  %s385_s11 = sshll.u32 %s453_s5, 4  ;;  %s386_s11 = int_to_ptr.vmem [resolvable:$false] %s385_s11 }
  0x3e   : > { %p383_p12 = pnand %p382_p6, %p667_p11  ;;  %s387_s13 = scalar_lea.vmem %s386_s11, 2048 }
  0x3f   : > { %p388_p8 = scmp.lt.s32.totalorder %s607_s28, %s386_s11  ;;  %p389_p10 = scmp.lt.s32.totalorder %s387_s13, %s381_s4 }
  0x40   : > { %p384_p13 = pneg %p383_p12 }
  0x41   : > { %153 = vrot.lane.b32.xlu1 %v141_v4, %s452_s25  ;;  %151 = vrot.lane.b32.xlu0 %v137_v5, %s452_s25  ;;  %p390_p0 = por %p389_p10, %p388_p8 }
  0x43   : > { %p391_p2 = pnand %p390_p0, %p384_p13 }
  0x45   : > { %157 = vrot.lane.b32.xlu1 %v142_v6, %s452_s25  ;;  %155 = vrot.lane.b32.xlu0 %v138_v7, %s452_s25 }
  0xab   : > { %v148_v10 = vpop.permute.xlu1 %147  ;;  %v144_v11 = vpop.permute.xlu0 %143 }
  0xac   : > { %v166_v13 = vsel %vm161_vm0, %v144_v11, %v148_v10 }
  0xad   : > { %v170_v17 = vrot.slane %v166_v13, 2 }
  0xaf   : > { %v150_v14 = vpop.permute.xlu1 %149  ;;  %v146_v15 = vpop.permute.xlu0 %145 }
  0xb0   : > { %v167_v16 = vsel %vm161_vm0, %v146_v15, %v150_v14 }
  0xb1   : > { %v174_v18 = vrot.slane %v167_v16, 2 }
  0xb3   : > { %v181_v19 = vsel %vm180_vm1, %v170_v17, %v174_v18  ;;  %v185_v20 = vsel %vm180_vm1, %v174_v18, %v170_v17  ;;  %v154_v21 = vpop.permute.xlu1 %153  ;;  %v152_v22 = vpop.permute.xlu0 %151 }
  0xb4   : > { %189 = vst [vmem:[%s586_s17] sm:$0xff] %v181_v19  ;;  %193 = vst [vmem:[%s586_s17 + $0x20] sm:$0xff] %v185_v20  ;;  %v165_v23 = vsel %vm161_vm0, %v150_v14, %v154_v21  ;;  %v164_v24 = vsel %vm161_vm0, %v148_v10, %v152_v22 }
  0xb5   : > { %v175_v25 = vrot.slane %v165_v23, 2  ;;  %v171_v26 = vrot.slane %v164_v24, 2 }
  0xb7   : > { %v182_v27 = vsel %vm180_vm1, %v171_v26, %v175_v25  ;;  %v186_v28 = vsel %vm180_vm1, %v175_v25, %v171_v26  ;;  %v158_v29 = vpop.permute.xlu1 %157  ;;  %v156_v30 = vpop.permute.xlu0 %155 }
  0xb8   : > { %190 = vst [vmem:[%s586_s17 + $0x8] sm:$0xff] %v182_v27  ;;  %194 = vst [vmem:[%s586_s17 + $0x28] sm:$0xff] %v186_v28  ;;  %v163_v31 = vsel %vm161_vm0, %v154_v21, %v158_v29  ;;  %v169_v32 = vsel %vm161_vm0, %v158_v29, %v146_v15  ;;  %v162_v33 = vsel %vm161_vm0, %v152_v22, %v156_v30 }
  0xb9   : > { %v168_v34 = vsel %vm161_vm0, %v156_v30, %v144_v11  ;;  %v176_v35 = vrot.slane %v163_v31, 2  ;;  %v177_v36 = vrot.slane %v169_v32, 2  ;;  %v172_v37 = vrot.slane %v162_v33, 2 }
  0xba   : > { %v173_v38 = vrot.slane %v168_v34, 2 }
  0xbb   : > { %v183_v39 = vsel %vm180_vm1, %v172_v37, %v176_v35  ;;  %v187_v41 = vsel %vm180_vm1, %v176_v35, %v172_v37 }
  0xbc   : > { %v184_v40 = vsel %vm180_vm1, %v173_v38, %v177_v36  ;;  %v188_v42 = vsel %vm180_vm1, %v177_v36, %v173_v38  ;;  %191 = vst [vmem:[%s586_s17 + $0x10] sm:$0xff] %v183_v39  ;;  %195 = vst [vmem:[%s586_s17 + $0x30] sm:$0xff] %v187_v41 }
  0xbd   : > { %192 = vst [vmem:[%s586_s17 + $0x18] sm:$0xff] %v184_v40  ;;  %196 = vst [vmem:[%s586_s17 + $0x38] sm:$0xff] %v188_v42 }
  0xbe   : > { %394 = shalt.err (!%p391_p2)
}
  0xbf   : > { %s395_s14 = scalar_lea.hbm %s605_s2, 1024  ;;  %s399_s21 = scalar_lea.hbm %s660_s1, 2048 }
  0xc0   : > { %p396_p4 = scmp.ne.s32.totalorder %s605_s2, %s395_s14  ;;  %p400_p9 = scmp.lt.u32.totalorder %s605_s2, %s660_s1 }
  0xc1   : > { %p401_p1 = scmp.lt.u32.totalorder %s399_s21, %s395_s14  ;;  %p403_p6 = scmp.lt.u32.totalorder %s395_s14, %s605_s2 }
  0xc2   : > { %p397_p5 = pnand %p396_p4, %p667_p11 }
  0xc3   : > { %p402_p3 = por %p401_p1, %p400_p9 }
  0xc4   : > { %p398_p7 = pneg %p397_p5 }
  0xc5   : > { %p404_p12 = por %p403_p6, %p402_p3 }
  0xc7   : > { %p405_p13 = pnand %p404_p12, %p398_p7 }
  0xc9   : > { %408 = shalt.err (!%p405_p13)
}
  0xca   : > { %s454_s26 = smov 512   ;;  %s455_s30 = smov 32  }
  0xcb   : > { %302 = dma.vmem_to_hbm [thread:$0]  (%p667_p11), %s607_s28, 1024, %s605_s2, %s198_s3, %s454_s26, %s454_s26, %s455_s30  }
  0xcc PF: > { %s226_s25 = sand.u32 1, %s435_s6   ;;  %p668_p8 = scmp.ne.s32.totalorder %s665_s19, 0 }
  0xcd   : > { %p669_p10 = scmp.ge.s32.totalorder %s447_s9, 2  ;;  %s227_s17 = scalar_lea.sflag [#allocation4], %s226_s25 }
  0xcf   : > { %p309_p0 = pnand %p669_p10, %p668_p8 }
  0xd1   : > { %430 = dma.done.wait (!%p309_p0), %s227_s17, 1024  }
  0xd2   : > { %432 = vsyncadd (!%p309_p0), %s227_s17, 4294966272  ;;  %p14_p2 = scmp.ge.s32.totalorder %s491_s12, 4   ;;  %s670_s6 = smov %s439_s7 }
  0xd3   : > { %s671_s7 = smov %s443_s8  ;;  %s672_s8 = smov %s503_s15 }
  0xd4   : > { %s673_s9 = smov %s491_s12  ;;  %16 = sbr.rel (!%p14_p2) target bundleno = 5 (0x5), region = 69 }
  0xdb   :  { %232 = vsyncpa [#allocation3], 1 }
  0xdc   :  { %234 = vsyncpa [#allocation3 + $0x1], 1 }
  0xdd   :  { %235 = vsyncpa [#allocation4], 1 }
  0xde   :  { %237 = vsyncpa [#allocation4 + $0x1], 1 }

</bundles_post_ra>
